<compile_context>
chip_gen: v6e
topology: v6e:2x2x1
jax: 0.10.0
libtpu: 0.0.40
codegen_flags: <defaults>
</compile_context>

<pallas_src>
import functools

import jax
import jax.numpy as jnp
from jax import lax
from jax.experimental import pallas as pl
from jax.experimental.pallas import tpu as pltpu


def _round_up(n: int, m: int) -> int:
    return (n + m - 1) // m * m


def _vmem_budget_bytes() -> int:
    """Generation-aware usable VMEM (per core), leaving compiler headroom."""
    try:
        cap = int(pltpu.get_tpu_info().vmem_capacity_bytes)
    except Exception:   # conservative (v7x-sized) fallback
        cap = 64 << 20
    return max(int(cap * 0.8), 16 << 20)


def _sum_lanes_f32(x):
    """Sum over the last (lane) axis with f32 accumulation, without
    materializing a (C, T)-sized f32 temporary."""
    if x.dtype == jnp.float32:
        return jnp.sum(x, axis=-1, keepdims=True)
    # Sub-f32 dtypes: ones-matvec on the (otherwise idle) MXU with native f32
    # accumulation — avoids the slab-sized upcast copy.
    ones = jnp.ones((x.shape[-1], 1), dtype=x.dtype)
    return jnp.dot(x, ones, preferred_element_type=jnp.float32)


# ---------------------------------------------------------------------------
# Path 1: fused single pass (whole (C, T) slab per batch element).
# ---------------------------------------------------------------------------
def _afms_fused_kernel(x_ref, w_ref, b_ref, alpha_ref, o_ref):
    x = x_ref[0]                                              # (C, T), native dtype
    mean = _sum_lanes_f32(x) * (1.0 / float(x.shape[-1]))     # (C, 1) f32

    # fc + sigmoid. W @ mean == (mean^T @ W^T)^T, matching nn.Linear.
    logits = jnp.dot(w_ref[...], mean,
                     preferred_element_type=jnp.float32,
                     precision=lax.Precision.HIGHEST) + b_ref[...]
    y = jax.nn.sigmoid(logits)                                # (C, 1) f32

    # (x + alpha) * y  ==  x*y + (alpha*y): one slab-wide multiply-add.
    ay = (alpha_ref[...] * y).astype(x.dtype)                 # (C, 1)
    o_ref[0] = (x * y.astype(x.dtype) + ay).astype(o_ref.dtype)


def _afms_fused(x, w, b, alpha, *, vmem_limit):
    B, C, T = x.shape
    return pl.pallas_call(
        _afms_fused_kernel,
        out_shape=jax.ShapeDtypeStruct((B, C, T), x.dtype),
        grid_spec=pltpu.PrefetchScalarGridSpec(
            num_scalar_prefetch=0,
            grid=(B,),
            in_specs=[
                pl.BlockSpec((1, C, T), lambda i: (i, 0, 0)),   # x slab
                pl.BlockSpec((C, C), lambda i: (0, 0)),         # fc weight
                pl.BlockSpec((C, 1), lambda i: (0, 0)),         # fc bias
                pl.BlockSpec((C, 1), lambda i: (0, 0)),         # alpha
            ],
            out_specs=pl.BlockSpec((1, C, T), lambda i: (i, 0, 0)),
        ),
        compiler_params=pltpu.CompilerParams(
            dimension_semantics=("parallel",),
            vmem_limit_bytes=vmem_limit,
        ),
    )(x, w, b, alpha)


# ---------------------------------------------------------------------------
# Path 2: T-tiled two-phase fallback.
# ---------------------------------------------------------------------------
def _afms_sum_kernel(x_ref, s_ref, *, true_t, t_tile):
    t = pl.program_id(1)

    @pl.when(t == 0)
    def _():
        s_ref[...] = jnp.zeros_like(s_ref)

    x = x_ref[0]                                              # (C, Tt)
    # The final T tile may be ragged: its out-of-bounds columns read undefined
    # VMEM, so mask them before reducing.
    col = lax.broadcasted_iota(jnp.int32, x.shape, 1) + t * t_tile
    xz = jnp.where(col < true_t, x, jnp.zeros_like(x))
    s_ref[0] += _sum_lanes_f32(xz)


def _afms_apply_kernel(x_ref, y_ref, alpha_ref, o_ref):
    x = x_ref[0]                                              # (C, Tt)
    y = y_ref[0]                                              # (C, 1) f32
    ay = (alpha_ref[...] * y).astype(x.dtype)
    o_ref[0] = (x * y.astype(x.dtype) + ay).astype(o_ref.dtype)


def _afms_tiled(x, w, b, alpha, *, vmem_limit, t_tile):
    B, C, T = x.shape
    n_t = pl.cdiv(T, t_tile)

    # Phase 1: per-(batch, channel) sums over T (output-resident accumulator).
    sums = pl.pallas_call(
        functools.partial(_afms_sum_kernel, true_t=T, t_tile=t_tile),
        out_shape=jax.ShapeDtypeStruct((B, C, 1), jnp.float32),
        grid_spec=pltpu.PrefetchScalarGridSpec(
            num_scalar_prefetch=0,
            grid=(B, n_t),
            in_specs=[pl.BlockSpec((1, C, t_tile), lambda bi, ti: (bi, 0, ti))],
            out_specs=pl.BlockSpec((1, C, 1), lambda bi, ti: (bi, 0, 0)),
        ),
        compiler_params=pltpu.CompilerParams(
            dimension_semantics=("parallel", "arbitrary"),
            vmem_limit_bytes=vmem_limit,
        ),
    )(x)

    # fc + sigmoid hoisted out of Pallas: one batched (B,C)@(C,C) matmul.
    mean = sums[:, :, 0] / float(T)                                   # (B, C) f32
    logits = jnp.dot(mean, w.astype(jnp.float32).T,
                     precision=lax.Precision.HIGHEST) + b.astype(jnp.float32)[:, 0]
    y = jax.nn.sigmoid(logits)[:, :, None]                            # (B, C, 1)

    # Phase 2: re-stream x in (1, C, Tt) tiles and apply (x + alpha) * y.
    return pl.pallas_call(
        _afms_apply_kernel,
        out_shape=jax.ShapeDtypeStruct((B, C, T), x.dtype),
        grid_spec=pltpu.PrefetchScalarGridSpec(
            num_scalar_prefetch=0,
            grid=(B, n_t),
            in_specs=[
                pl.BlockSpec((1, C, t_tile), lambda bi, ti: (bi, 0, ti)),
                pl.BlockSpec((1, C, 1), lambda bi, ti: (bi, 0, 0)),
                pl.BlockSpec((C, 1), lambda bi, ti: (0, 0)),
            ],
            out_specs=pl.BlockSpec((1, C, t_tile), lambda bi, ti: (bi, 0, ti)),
        ),
        compiler_params=pltpu.CompilerParams(
            # Both axes parallel: keeps both v7x TensorCores busy even at B==1
            # (no-op on single-core v5e/v6e).
            dimension_semantics=("parallel", "parallel"),
            vmem_limit_bytes=vmem_limit,
        ),
    )(x, y, alpha.astype(jnp.float32))


# ---------------------------------------------------------------------------
# Public wrapper.
# ---------------------------------------------------------------------------
def afms(x, w, b, alpha, *, force_tiled=False, t_tile=None):
    """AFMS forward. x: (B, C, T); w: (C, C); b: (C, 1); alpha: (C, 1)."""
    B, C, T = x.shape
    itemsize = jnp.dtype(x.dtype).itemsize
    cp = _round_up(C, 8)        # sublane-padded layout extent
    tp = _round_up(T, 128)      # lane-padded layout extent

    budget = _vmem_budget_bytes()

    # Fused-path footprint: x + out slabs double-buffered, fc weight
    # (double-buffered), reduction constant (bf16 path), per-channel vectors,
    # compiler scratch headroom. Explicit path choice — no silent clamping.
    slab = cp * tp * itemsize
    needed_fused = (4 * slab
                    + 2 * cp * cp * 4
                    + tp * 512
                    + 8 * cp * 512
                    + (2 << 20))

    if not force_tiled and needed_fused <= budget:
        return _afms_fused(x, w, b, alpha, vmem_limit=budget)

    # T-tiled fallback: largest 128-multiple tile whose double-buffered
    # in + out tiles fit the budget.
    if t_tile is None:
        per_col = 4 * cp * itemsize
        t_tile = max(((budget - (4 << 20)) // per_col) // 128 * 128, 128)
    if t_tile >= T:
        t_tile = T                       # single full-extent tile is legal
    else:
        t_tile = max(t_tile // 128 * 128, 128)
    # TODO(synk): on v7x with B == 1 the phase-1 reduction still runs on one
    # TensorCore; a cross-core split of the T reduction could recover ~2x there.
    return _afms_tiled(x, w, b, alpha, vmem_limit=budget, t_tile=t_tile)


def afms_ref(x, w, b, alpha):
    # Pure-JAX reference mirroring the PyTorch forward (f32 math).
    m = jnp.mean(x.astype(jnp.float32), axis=-1)                      # (B, C)
    y = jax.nn.sigmoid(jnp.dot(m, w.astype(jnp.float32).T,
                               precision=lax.Precision.HIGHEST)
                       + b.astype(jnp.float32)[:, 0])                 # (B, C)
    out = (x.astype(jnp.float32) + alpha.astype(jnp.float32)[None]) * y[:, :, None]
    return out.astype(x.dtype)


if __name__ == "__main__":
    key = jax.random.PRNGKey(0)
    kx1, kx2, kw, kb = jax.random.split(key, 4)

    B, C, T = 2, 4, 16
    bound = 1.0 / (C ** 0.5)
    # Parameter shapes from AFMS.__init__: alpha = ones((C, 1)); fc = Linear(C, C).
    w = jax.random.uniform(kw, (C, C), minval=-bound, maxval=bound, dtype=jnp.float32)
    b = jax.random.uniform(kb, (C, 1), minval=-bound, maxval=bound, dtype=jnp.float32)
    alpha = jnp.ones((C, 1), dtype=jnp.float32)

    # 1) Fused single-pass path (ragged small shapes -> masked tail store).
    x1 = jax.random.normal(kx1, (B, C, T), dtype=jnp.float32)
    out1 = jax.block_until_ready(afms(x1, w, b, alpha))
    ref1 = afms_ref(x1, w, b, alpha)
    assert out1.shape == (B, C, T)
    assert jnp.allclose(out1, ref1, atol=1e-4, rtol=1e-4), \
        float(jnp.max(jnp.abs(out1 - ref1)))

    # 2) T-tiled two-phase fallback (forced; 300 = 2 full 128 tiles + ragged tail).
    T2 = 300
    x2 = jax.random.normal(kx2, (B, C, T2), dtype=jnp.float32)
    out2 = jax.block_until_ready(afms(x2, w, b, alpha, force_tiled=True, t_tile=128))
    ref2 = afms_ref(x2, w, b, alpha)
    assert out2.shape == (B, C, T2)
    assert jnp.allclose(out2, ref2, atol=1e-4, rtol=1e-4), \
        float(jnp.max(jnp.abs(out2 - ref2)))

    print("KERNEL_OK")
</pallas_src>

<mosaic_0001>
module attributes {stable_mosaic.version = 11 : i64} {
  func.func @_afms_fused_kernel(%arg0: i32, %arg1: memref<1x4x16xf32, #tpu.memory_space<vmem>>, %arg2: memref<4x4xf32, #tpu.memory_space<vmem>>, %arg3: memref<4x1xf32, #tpu.memory_space<vmem>>, %arg4: memref<4x1xf32, #tpu.memory_space<vmem>>, %arg5: memref<1x4x16xf32, #tpu.memory_space<vmem>>) attributes {dimension_semantics = [#tpu.dimension_semantics<parallel>], iteration_bounds = array<i64: 2>, scalar_prefetch = 0 : i64, scratch_operands = 0 : i64, tpu.core_type = #tpu.core_type<tc>, window_params = [{transform_indices = @transform_0, window_bounds = array<i64: 1, 4, 16>}, {pipeline_mode = #tpu.pipeline_mode<synchronous>, transform_indices = @transform_1, window_bounds = array<i64: 4, 4>}, {pipeline_mode = #tpu.pipeline_mode<synchronous>, transform_indices = @transform_2, window_bounds = array<i64: 4, 1>}, {pipeline_mode = #tpu.pipeline_mode<synchronous>, transform_indices = @transform_3, window_bounds = array<i64: 4, 1>}, {transform_indices = @transform_4, window_bounds = array<i64: 1, 4, 16>}]} {
    %c0 = arith.constant 0 : index
    %c0_0 = arith.constant 0 : index
    %c0_1 = arith.constant 0 : index
    %0 = vector.load %arg1[%c0, %c0_0, %c0_1] : memref<1x4x16xf32, #tpu.memory_space<vmem>>, vector<1x4x16xf32>
    %1 = vector.shape_cast %0 : vector<1x4x16xf32> to vector<4x16xf32>
    %cst = arith.constant dense<0.000000e+00> : vector<4xf32>
    %2 = vector.multi_reduction <add>, %1, %cst [1] : vector<4x16xf32> to vector<4xf32>
    %3 = vector.shape_cast %2 : vector<4xf32> to vector<4x1xf32>
    %cst_2 = arith.constant 6.250000e-02 : f32
    %4 = vector.broadcast %cst_2 : f32 to vector<4x1xf32>
    %5 = arith.mulf %3, %4 : vector<4x1xf32>
    %c0_3 = arith.constant 0 : index
    %c0_4 = arith.constant 0 : index
    %6 = vector.load %arg2[%c0_3, %c0_4] : memref<4x4xf32, #tpu.memory_space<vmem>>, vector<4x4xf32>
    %cst_5 = arith.constant dense<0.000000e+00> : vector<4x1xf32>
    %7 = tpu.matmul %6, %5, %cst_5 {dimension_numbers = #tpu.dot_dimension_numbers<[1], [0], [0], [1], [0, 0, 1, 1], [], []>, precision = #tpu.contract_precision<fp32>} : vector<4x4xf32>, vector<4x1xf32>, vector<4x1xf32> -> vector<4x1xf32>
    %c0_6 = arith.constant 0 : index
    %c0_7 = arith.constant 0 : index
    %8 = vector.load %arg3[%c0_6, %c0_7] : memref<4x1xf32, #tpu.memory_space<vmem>>, vector<4x1xf32>
    %9 = arith.addf %7, %8 : vector<4x1xf32>
    %10 = arith.negf %9 : vector<4x1xf32>
    %11 = math.exp %10 : vector<4x1xf32>
    %cst_8 = arith.constant 1.000000e+00 : f32
    %12 = vector.broadcast %cst_8 : f32 to vector<4x1xf32>
    %13 = arith.addf %12, %11 : vector<4x1xf32>
    %14 = arith.divf %12, %13 : vector<4x1xf32>
    %c0_9 = arith.constant 0 : index
    %c0_10 = arith.constant 0 : index
    %15 = vector.load %arg4[%c0_9, %c0_10] : memref<4x1xf32, #tpu.memory_space<vmem>>, vector<4x1xf32>
    %16 = arith.mulf %15, %14 : vector<4x1xf32>
    %17 = vector.broadcast %14 : vector<4x1xf32> to vector<4x16xf32>
    %18 = arith.mulf %1, %17 : vector<4x16xf32>
    %19 = vector.broadcast %16 : vector<4x1xf32> to vector<4x16xf32>
    %20 = arith.addf %18, %19 : vector<4x16xf32>
    %c0_11 = arith.constant 0 : index
    %c0_12 = arith.constant 0 : index
    %c0_13 = arith.constant 0 : index
    %21 = vector.load %arg5[%c0_11, %c0_12, %c0_13] : memref<1x4x16xf32, #tpu.memory_space<vmem>>, vector<1x4x16xf32>
    %22 = vector.shape_cast %21 : vector<1x4x16xf32> to vector<4x16xf32>
    %23 = vector.shape_cast %20 : vector<4x16xf32> to vector<1x4x16xf32>
    tpu.vector_store %arg5[%c0_11, %c0_12, %c0_13], %23 {strides = array<i32>} : memref<1x4x16xf32, #tpu.memory_space<vmem>>, vector<1x4x16xf32>,
    return
  }
  func.func @transform_0(%arg0: i32) -> (i32, i32, i32) {
    %c0_i32 = arith.constant 0 : i32
    %c0_i32_0 = arith.constant 0 : i32
    %c0_i32_1 = arith.constant 0 : i32
    return %arg0, %c0_i32, %c0_i32_0 : i32, i32, i32
  }
  func.func @transform_1(%arg0: i32) -> (i32, i32) {
    %c0_i32 = arith.constant 0 : i32
    %c0_i32_0 = arith.constant 0 : i32
    %c0_i32_1 = arith.constant 0 : i32
    return %c0_i32, %c0_i32_0 : i32, i32
  }
  func.func @transform_2(%arg0: i32) -> (i32, i32) {
    %c0_i32 = arith.constant 0 : i32
    %c0_i32_0 = arith.constant 0 : i32
    %c0_i32_1 = arith.constant 0 : i32
    return %c0_i32, %c0_i32_0 : i32, i32
  }
  func.func @transform_3(%arg0: i32) -> (i32, i32) {
    %c0_i32 = arith.constant 0 : i32
    %c0_i32_0 = arith.constant 0 : i32
    %c0_i32_1 = arith.constant 0 : i32
    return %c0_i32, %c0_i32_0 : i32, i32
  }
  func.func @transform_4(%arg0: i32) -> (i32, i32, i32) {
    %c0_i32 = arith.constant 0 : i32
    %c0_i32_0 = arith.constant 0 : i32
    %c0_i32_1 = arith.constant 0 : i32
    return %arg0, %c0_i32, %c0_i32_0 : i32, i32, i32
  }
}

</mosaic_0001>

<bundles_post_ra>
// kernel: tpu_custom_call.1
= control target key start
LH: loop header
LB: loop body
LE: loop exit
PB: predicated region body
PF: predicated region fallthrough
CT: control target
= control target key end

     0   :  { %9 = vsyncpa [#allocation3], 0  ;;  %s1133_s0 = inlined_call_operand.vmem [shape: f32[2,4,16], index: 0, kind: input, shape index: {}]   ;;  %s1134_s1 = inlined_call_operand.hbm [shape: f32[4,4], index: 1, kind: input, shape index: {}]   ;;  %s1135_s2 = inlined_call_operand.vmem [shape: f32[4,1], index: 2, kind: input, shape index: {}]   ;;  %s1136_s3 = inlined_call_operand.vmem [shape: f32[4,1], index: 3, kind: input, shape index: {}]   ;;  %s1137_s4 = inlined_call_operand.hbm [shape: f32[2,4,16], index: 4, kind: output, shape index: {}]  }
   0x1   :  { %10 = vsyncpa [#allocation4], 0 }
   0x2   :  { %12 = vsyncpa [#allocation4 + $0x1], 0  ;;  %s1010_s15 = smov 0   ;;  %s1012_s16 = smov 0  }
   0x3   :  { %s1014_s17 = smov 0   ;;  %s1016_s18 = smov 0  }
   0x4 LB: > { %s1031_s19 = sadd.s32 4294967295, %s978_s18   ;;  %s774_s20 = sadd.s32 4294967294, %s978_s18   ;;  %s978_s18 = sphi %s1016_s18, %s1145_s18   ;;  %s974_s17 = sphi %s1014_s17, %s1144_s17   ;;  %s970_s16 = sphi %s1012_s16, %s1143_s16   ;;  %s966_s15 = sphi %s1010_s15, %s1142_s15  }
   0x5   : > { %s1035_s21 = sadd.s32 1, %s978_s18   ;;  %s114_s22 = sadd.s32 1, %s974_s17 }
   0x6   : > { %s111_s23 = ssub.s32 %s978_s18, %s1035_s21  ;;  %p124_p0 = scmp.ne.s32.totalorder %s974_s17, %s970_s16 }
   0x7   : > { %p112_p1 = scmp.eq.s32.totalorder %s111_s23, 0  ;;  %p125_p2 = scmp.eq.s32.totalorder %s1031_s19, 1 }
   0x8   : > { %p130_p3 = scmp.ne.s32.totalorder %s970_s16, %s966_s15  ;;  %p131_p4 = scmp.eq.s32.totalorder %s774_s20, 1 }
   0x9   : > { %s1046_s24 = scalar_select %p112_p1, %s974_s17, %s114_s22  }
   0xa   : > { %p1048_p5 = por %p125_p2, %p124_p0  ;;  %p1052_p6 = por %p131_p4, %p130_p3 }
   0xb   : > { %p775_p7 = scmp.ge.s32.totalorder %s978_s18, 1  ;;  %p138_p8 = scmp.lt.s32.totalorder %s978_s18, 3 }
   0xc   : > { %s1139_s26 = scalar_select %p1052_p6, 1, 0 }
   0xd   : > { %p843_p9 = scmp.eq.s32.totalorder %s1031_s19, 0  ;;  %p1059_p10 = pnand %p775_p7, %p138_p8 }
   0xe   : > { %s980_s28 = smov [#allocation2]  }
   0xf   : > { %s151_s29 = sshll.u32 %s980_s28, 4  ;;  %p835_p11 = pneg %p1059_p10  ;;  %s152_s29 = int_to_ptr.vmem [resolvable:$true] %s151_s29 }
  0x10   : > { %s899_s30 = scalar_lea.vmem %s152_s29, 64  ;;  %p907_p3 = scmp.lt.s32.totalorder %s152_s29, %s152_s29 }
  0x11   : > { %p836_p12 = pnand %p843_p9, %p835_p11  ;;  %p900_p0 = scmp.ne.s32.totalorder %s152_s29, %s899_s30 }
  0x12   : > { %p908_p4 = scmp.lt.s32.totalorder %s899_s30, %s899_s30 }
  0x13   : > { %p890_p13 = pneg %p836_p12 }
  0x14   : > { %p909_p6 = por %p908_p4, %p907_p3 }
  0x15   : > { %p902_p1 = pnand %p900_p0, %p890_p13 }
  0x17   : > { %p903_p2 = pneg %p902_p1 }
  0x19   : > { %p910_p7 = pnand %p909_p6, %p903_p2 }
  0x1b   : > { %913 = shalt.err (!%p910_p7)
}
  0x1c   : > { %838 = dma.hbm_to_vmem [thread:$0]  (!%p836_p12), %s1134_s1, 64, %s152_s29, [#allocation3]  }
  0x1d   : > { %177 = sbr.rel (%p1059_p10) target bundleno = 571 (0x23b), region = 36 }
  0x22   : > { %957 = dma.done.wait (%p843_p9), [#allocation3], 64  }
  0x23   : > { %959 = vsyncadd (%p843_p9), [#allocation3], 4294967232  ;;  %p202_p8 = scmp.lt.s32.totalorder %s1031_s19, 1  ;;  %vm207_vm0 = vcmask 125952   ;;  %v981_v2 = vmov 0.0   ;;  %vm982_vm1 = vmmov 0  }
  0x24   : > { %799 = vmatprep.subr.mxu0 %v981_v2  ;;  %804 = vmatprep.subr.mxu1 %v981_v2  ;;  %v212_v3 = vld [vmem:[#allocation2] sm:$0xf]  ;;  %vm214_vm2 = vcmask 31744   ;;  %vm218_vm3 = vcmask 1043456   ;;  %v983_v18 = vmov 0   ;;  %s199_s22 = sand.u32 1, %s970_s16  }
  0x25   : > { %s203_s7 = scalar_select %p202_p8, %s1031_s19, 1  ;;  %801 = vmatprep.mubr.msk.f32.mxu0 %vm982_vm1, %v981_v2  ;;  %806 = vmatprep.mubr.msk.f32.mxu1 %vm982_vm1, %v981_v2  ;;  %v216_v4 = vsel %vm214_vm2, %v212_v3, 0  ;;  %v213_v20 = vld [vmem:[%s1135_s2] sm:$0xf] }
  0x26   : > { %v288_v5 = vand.u32 4294901760, %v216_v4  ;;  %882 = vset.pattern.permute.xlu0 %v983_v18  ;;  %883 = vset.pattern.permute.xlu1 %v983_v18  ;;  %v674_v41 = vld [vmem:[%s1136_s3] sm:$0xf]  ;;  %s780_s23 = sshll.u32 %s199_s22, 2  ;;  %s784_s27 = sshll.u32 %s1031_s19, 6 }
  0x27   : > { %s781_s8 = sshll.u32 %s203_s7, 2  ;;  %s201_s28 = scalar_lea.vmem [#allocation5], %s780_s23 }
  0x28   : > { %s205_s11 = scalar_lea.vmem %s1133_s0, %s781_s8  ;;  %v289_v6 = vsub.f32 %v216_v4, %v288_v5  ;;  %s703_s29 = sshll.u32 %s201_s28, 4  ;;  %s704_s29 = int_to_ptr.vmem [resolvable:$true] %s703_s29 }
  0x29   : > { %v1081_v0 = vld [vmem:[%s205_s11] sm:$0xf]  ;;  %s701_s6 = scalar_lea.hbm %s1137_s4, %s784_s27  ;;  %s690_s7 = scalar_lea.sflag [#allocation4], %s199_s22 }
  0x2a   : > { %v208_v1 = vsel %vm207_vm0, %v1081_v0, 0.0  ;;  %v290_v7 = vand.u32 4294901760, %v289_v6  ;;  %s914_s8 = scalar_lea.vmem %s704_s29, 64  ;;  %s984_s19 = smov [#allocation5]  }
  0x2b   : > { %209 = vadd.xlane.f32.xlu0 %v208_v1  ;;  %p915_p6 = scmp.ne.s32.totalorder %s704_s29, %s914_s8  ;;  %s918_s9 = sshll.u32 %s984_s19, 4  ;;  %s919_s9 = int_to_ptr.vmem [resolvable:$false] %s918_s9 }
  0x2c   : > { %v291_v8 = vsub.f32 %v289_v6, %v290_v7  ;;  %s920_s10 = scalar_lea.vmem %s919_s9, 128  ;;  %p921_p11 = scmp.lt.s32.totalorder %s704_s29, %s919_s9 }
  0x2d   : > { %p916_p9 = pnand %p915_p6, %p1048_p5  ;;  %p922_p12 = scmp.lt.s32.totalorder %s920_s10, %s914_s8 }
  0x2e   : > { %v292_v12 = vand.u32 4294901760, %v291_v8 }
  0x2f   : > { %p917_p10 = pneg %p916_p9  ;;  %p923_p13 = por %p922_p12, %p921_p11 }
  0x31   : > { %p924_p0 = pnand %p923_p13, %p917_p10 }
  0xb4   : > { %v210_v9 = vpop.xlane.xlu0 %209 }
  0xb5   : > { %v211_v10 = vmul.f32 0.0625, %v210_v9 }
  0xb7   : > { %v220_v11 = vsel %vm218_vm3, %v211_v10, 0 }
  0xb8   : > { %v253_v13 = vand.u32 4294901760, %v220_v11 }
  0xba   : > { %v330_v14 = vsub.f32 %v220_v11, %v253_v13  ;;  %800 = vmatpush3.msra.mxu0 %v253_v13 }
  0xbb   : > { %802 = vmatmul.mubr.f32.vlgmr.msra.gmra.mxu0 %v292_v12  ;;  %809 = vmatprep.subr.mxu0 %v981_v2 }
  0xbc   : > { %810 = vmatpush3.msra.mxu0 %v330_v14  ;;  %811 = vmatprep.mubr.msk.f32.mxu0 %vm982_vm1, %v981_v2  ;;  %v331_v15 = vand.u32 4294901760, %v330_v14 }
  0xbd   : > { %819 = vmatprep.subr.mxu0 %v981_v2 }
  0xbe   : > { %v332_v16 = vsub.f32 %v330_v14, %v331_v15 }
  0xbf   : > { %812 = vmatmul.mubr.f32.vlgmr.msra.gmra.mxu0 %v289_v6 }
  0xc0   : > { %820 = vmatpush3.msra.mxu0 %v331_v15  ;;  %v333_v17 = vand.u32 4294901760, %v332_v16  ;;  %821 = vmatprep.mubr.msk.f32.mxu0 %vm982_vm1, %v981_v2 }
  0xc2   : > { %805 = vmatpush3.msra.mxu1 %v333_v17 }
  0xc3   : > { %807 = vmatmul.mubr.f32.vlgmr.msra.gmra.mxu1 %v288_v5  ;;  %814 = vmatprep.subr.mxu1 %v981_v2 }
  0xc4   : > { %815 = vmatpush3.msra.mxu1 %v253_v13  ;;  %816 = vmatprep.mubr.msk.f32.mxu1 %vm982_vm1, %v981_v2 }
  0xc5   : > { %824 = vmatprep.subr.mxu1 %v981_v2  ;;  %822 = vmatmul.mubr.f32.vlgmr.msra.gmra.mxu0 %v288_v5 }
  0xc7   : > { %817 = vmatmul.mubr.f32.vlgmr.msra.gmra.mxu1 %v290_v7 }
  0xc8   : > { %825 = vmatpush3.msra.mxu1 %v253_v13  ;;  %826 = vmatprep.mubr.msk.f32.mxu1 %vm982_vm1, %v981_v2 }
  0xcb   : > { %827 = vmatmul.mubr.f32.vlgmr.msra.gmra.mxu1 %v288_v5 }
 0x17b   : > { %v294_v19 = vpop.f32.mrf.mxu0 }
 0x17c   : > { %v295_v23 = vadd.f32 %v294_v19, %v213_v20 }
 0x17d   : > { %v803_v21 = vpop.f32.mrf.mxu0 }
 0x17f   : > { %v444_v22 = vpop.f32.mrf.mxu0 }
 0x181   : > { %v813_v24 = vpop.f32.mrf.mxu0 }
 0x183   : > { %v370_v25 = vpop.f32.mrf.mxu1 }
 0x184   : > { %v371_v26 = vadd.f32 %v370_v25, %v295_v23 }
 0x185   : > { %v808_v27 = vpop.f32.mrf.mxu1  ;;  %v592_v28 = vpop.f32.mrf.mxu0 }
 0x186   : > { %v445_v29 = vadd.f32 %v444_v22, %v371_v26 }
 0x187   : > { %v518_v30 = vpop.f32.mrf.mxu1  ;;  %v823_v31 = vpop.f32.mrf.mxu0 }
 0x188   : > { %v519_v32 = vadd.f32 %v518_v30, %v445_v29 }
 0x189   : > { %v818_v33 = vpop.f32.mrf.mxu1 }
 0x18a   : > { %v593_v34 = vadd.f32 %v592_v28, %v519_v32 }
 0x18b   : > { %v664_v35 = vpop.f32.mrf.mxu1 }
 0x18c   : > { %v665_v36 = vadd.f32 %v664_v35, %v593_v34 }
 0x18d   : > { %v828_v37 = vpop.f32.mrf.mxu1 }
 0x18e   : > { %v782_v38 = vmul.f32 -1.442695, %v665_v36 }
 0x190   : > { %884 = vpow2.f32 %v782_v38 }
 0x19d   : > { %v885_v39 = vpop.eup %884 }
 0x19e   : > { %v671_v40 = vadd.f32 1.0, %v885_v39 }
 0x1a0   : > { %886 = vrcp.f32 %v671_v40 }
 0x1ad   : > { %v887_v42 = vpop.eup %886 }
 0x1ae   : > { %678 = vperm.xlu0 %882, %v887_v42   ;;  %v675_v43 = vmul.f32 %v887_v42, %v674_v41 }
 0x1b0   : > { %684 = vperm.xlu1 %883, %v675_v43  }
 0x229   : > { %v679_v44 = vpop.permute.xlu0 %678 }
 0x22a   : > { %v681_v45 = vmul.f32 %v679_v44, %v1081_v0 }
 0x22b   : > { %v685_v46 = vpop.permute.xlu1 %684 }
 0x22c   : > { %v687_v47 = vadd.f32 %v685_v46, %v681_v45 }
 0x22e   : > { %688 = vst.msk [vmem:[%s201_s28] sm:$0xf] %vm207_vm0, %v687_v47 }
 0x22f   : > { %927 = shalt.err (!%p924_p0)
}
 0x230   : > { %s928_s11 = scalar_lea.hbm %s701_s6, 64  ;;  %s932_s14 = scalar_lea.hbm %s1137_s4, 128 }
 0x231   : > { %p929_p1 = scmp.ne.s32.totalorder %s701_s6, %s928_s11  ;;  %p933_p4 = scmp.lt.s32.totalorder %s701_s6, %s1137_s4 }
 0x232   : > { %p934_p7 = scmp.lt.s32.totalorder %s932_s14, %s928_s11 }
 0x233   : > { %p930_p2 = pnand %p929_p1, %p1048_p5 }
 0x234   : > { %p935_p8 = por %p934_p7, %p933_p4 }
 0x235   : > { %p931_p3 = pneg %p930_p2 }
 0x237   : > { %p936_p6 = pnand %p935_p8, %p931_p3 }
 0x239   : > { %939 = shalt.err (!%p936_p6)
}
 0x23a   : > { %833 = dma.vmem_to_hbm [thread:$0]  (%p1048_p5), %s704_s29, 64, %s701_s6, %s690_s7  }
 0x23b PF: > { %p845_p9 = scmp.ge.s32.totalorder %s978_s18, 2  ;;  %s715_s23 = sand.u32 1, %s966_s15  }
 0x23c   : > { %p1141_p10 = scmp.ne.s32.totalorder %s1139_s26, 0  ;;  %s716_s27 = scalar_lea.sflag [#allocation4], %s715_s23 }
 0x23e   : > { %p840_p11 = pnand %p845_p9, %p1141_p10 }
 0x240   : > { %p841_p12 = pneg %p840_p11 }
 0x242   : > { %961 = dma.done.wait (%p841_p12), %s716_s27, 64  }
 0x243   : > { %963 = vsyncadd (%p841_p12), %s716_s27, 4294967232  ;;  %p15_p13 = scmp.ge.s32.totalorder %s1035_s21, 4   ;;  %s1142_s15 = smov %s970_s16 }
 0x244   : > { %s1143_s16 = smov %s974_s17  ;;  %s1144_s17 = smov %s1046_s24 }
 0x245   : > { %s1145_s18 = smov %s1035_s21  ;;  %17 = sbr.rel (!%p15_p13) target bundleno = 4 (0x4), region = 76 }
 0x24a   :  { %721 = vsyncpa [#allocation3], 1 }
 0x24b   :  { %723 = vsyncpa [#allocation3 + $0x1], 1 }
 0x24c   :  { %724 = vsyncpa [#allocation4], 1 }
 0x24d   :  { %726 = vsyncpa [#allocation4 + $0x1], 1 }

</bundles_post_ra>
